<compile_context>
chip_gen: v7x
topology: tpu7x:2x2x1
jax: 0.10.0
libtpu: 0.0.40
codegen_flags: <defaults>
</compile_context>

<pallas_src>
import jax
import jax.numpy as jnp
from jax.experimental import pallas as pl
from jax.experimental.pallas import tpu as pltpu


def _round_up(x: int, m: int) -> int:
    return (x + m - 1) // m * m


def _tae_decoder_kernel(x_ref, w_ref, b_ref, o_ref):
    # x_ref: (TM, H2)   w_ref: (H2, OUT)   b_ref: (1, OUT)   o_ref: (TM, OUT)
    acc = jnp.dot(x_ref[...], w_ref[...], preferred_element_type=jnp.float32)
    o_ref[...] = (acc + b_ref[...]).astype(o_ref.dtype)


def tae_decoder_forward(features, weight, bias, *, block_rows=4096):
    """features: (B, T, H2) float32
       weight:   (H2, OUT, 1)  (PyTorch ConvTranspose1d weight layout)
       bias:     (OUT,)
       returns:  (B, T, OUT)
    """
    B, T, H2 = features.shape
    OUT = weight.shape[1]
    M = B * T

    x = features.reshape(M, H2)               # (M, H2)
    w = weight[:, :, 0]                       # (H2, OUT)
    b = bias.reshape(1, OUT)                  # (1, OUT)

    # Row-tile size: big enough to amortize the ~0.35us/step grid overhead,
    # never larger than the (sublane-aligned) problem. Rows must be a multiple
    # of 8 (f32 sublane) unless the block covers the whole array.
    if M >= block_rows:
        tm = block_rows
    else:
        tm = max(8, _round_up(M, 8))
    m_pad = _round_up(M, tm)
    if m_pad != M:
        x = jnp.pad(x, ((0, m_pad - M), (0, 0)))
    grid = (m_pad // tm,)

    cost = pl.CostEstimate(
        flops=2 * M * H2 * OUT,
        transcendentals=0,
        bytes_accessed=4 * (M * H2 + M * OUT + H2 * OUT),
    )

    out = pl.pallas_call(
        _tae_decoder_kernel,
        out_shape=jax.ShapeDtypeStruct((m_pad, OUT), features.dtype),
        grid_spec=pl.GridSpec(
            grid=grid,
            in_specs=[
                pl.BlockSpec((tm, H2), lambda i: (i, 0)),   # streamed rows
                pl.BlockSpec((H2, OUT), lambda i: (0, 0)),  # resident weight
                pl.BlockSpec((1, OUT), lambda i: (0, 0)),   # resident bias
            ],
            out_specs=pl.BlockSpec((tm, OUT), lambda i: (i, 0)),
        ),
        compiler_params=pltpu.CompilerParams(
            dimension_semantics=("parallel",),  # independent row tiles -> both TCs on v7x
        ),
        cost_estimate=cost,
    )(x, w, b)

    return out[:M].reshape(B, T, OUT)


def _reference(features, weight, bias):
    return jnp.einsum("btc,co->bto", features, weight[:, :, 0]) + bias[None, None, :]


if __name__ == "__main__":
    # Small shapes consistent with the module: filter_lstm = [64, 32]
    B, T = 2, 8
    H1, H2 = 64, 32      # hidden_lstm_1, hidden_lstm_2
    OUT = 10             # fixed out_channels in the module

    key = jax.random.PRNGKey(0)
    k_feat, k_w, k_b, k_feat2 = jax.random.split(key, 4)

    # features: output of the (encoder's) second LSTM -> (B, T, H2)
    features = jax.random.normal(k_feat, (B, T, H2), dtype=jnp.float32)

    # Deterministic parameter init (ConvTranspose1d shapes: W (in, out, k), b (out,))
    weight = jax.random.normal(k_w, (H2, OUT, 1), dtype=jnp.float32) * 0.1
    bias = jax.random.normal(k_b, (OUT,), dtype=jnp.float32) * 0.1

    out = tae_decoder_forward(features, weight, bias)
    out = jax.block_until_ready(out)
    ref = _reference(features, weight, bias)
    assert out.shape == (B, T, OUT)
    assert jnp.allclose(out, ref, atol=1e-5, rtol=1e-5)

    # Second small case exercising the multi-tile + padded-remainder path
    # (M = 3*37 = 111 rows, block_rows=64 -> grid=2 with a masked last tile).
    B2, T2 = 3, 37
    features2 = jax.random.normal(k_feat2, (B2, T2, H2), dtype=jnp.float32)
    out2 = tae_decoder_forward(features2, weight, bias, block_rows=64)
    out2 = jax.block_until_ready(out2)
    ref2 = _reference(features2, weight, bias)
    assert out2.shape == (B2, T2, OUT)
    assert jnp.allclose(out2, ref2, atol=1e-5, rtol=1e-5)

    print("KERNEL_OK")
</pallas_src>

<mosaic_0001>
module attributes {stable_mosaic.version = 11 : i64} {
  func.func @_tae_decoder_kernel(%arg0: i32, %arg1: memref<16x32xf32, #tpu.memory_space<vmem>>, %arg2: memref<32x10xf32, #tpu.memory_space<vmem>>, %arg3: memref<1x10xf32, #tpu.memory_space<vmem>>, %arg4: memref<16x10xf32, #tpu.memory_space<vmem>>) attributes {dimension_semantics = [#tpu.dimension_semantics<parallel>], iteration_bounds = array<i64: 1>, scalar_prefetch = 0 : i64, scratch_operands = 0 : i64, tpu.core_type = #tpu.core_type<tc>, window_params = [{transform_indices = @transform_0, window_bounds = array<i64: 16, 32>}, {pipeline_mode = #tpu.pipeline_mode<synchronous>, transform_indices = @transform_1, window_bounds = array<i64: 32, 10>}, {pipeline_mode = #tpu.pipeline_mode<synchronous>, transform_indices = @transform_2, window_bounds = array<i64: 1, 10>}, {transform_indices = @transform_3, window_bounds = array<i64: 16, 10>}]} {
    %c0 = arith.constant 0 : index
    %c0_0 = arith.constant 0 : index
    %0 = vector.load %arg1[%c0, %c0_0] : memref<16x32xf32, #tpu.memory_space<vmem>>, vector<16x32xf32>
    %c0_1 = arith.constant 0 : index
    %c0_2 = arith.constant 0 : index
    %1 = vector.load %arg2[%c0_1, %c0_2] : memref<32x10xf32, #tpu.memory_space<vmem>>, vector<32x10xf32>
    %cst = arith.constant dense<0.000000e+00> : vector<16x10xf32>
    %2 = tpu.matmul %0, %1, %cst {dimension_numbers = #tpu.dot_dimension_numbers<[1], [0], [0], [1], [0, 0, 1, 1], [], []>} : vector<16x32xf32>, vector<32x10xf32>, vector<16x10xf32> -> vector<16x10xf32>
    %c0_3 = arith.constant 0 : index
    %c0_4 = arith.constant 0 : index
    %3 = vector.load %arg3[%c0_3, %c0_4] : memref<1x10xf32, #tpu.memory_space<vmem>>, vector<1x10xf32>
    %4 = vector.broadcast %3 : vector<1x10xf32> to vector<16x10xf32>
    %5 = arith.addf %2, %4 : vector<16x10xf32>
    %c0_5 = arith.constant 0 : index
    %c0_6 = arith.constant 0 : index
    %6 = vector.load %arg4[%c0_5, %c0_6] : memref<16x10xf32, #tpu.memory_space<vmem>>, vector<16x10xf32>
    tpu.vector_store %arg4[%c0_5, %c0_6], %5 {strides = array<i32>} : memref<16x10xf32, #tpu.memory_space<vmem>>, vector<16x10xf32>,
    return
  }
  func.func @transform_0(%arg0: i32) -> (i32, i32) {
    %c0_i32 = arith.constant 0 : i32
    %c0_i32_0 = arith.constant 0 : i32
    return %arg0, %c0_i32 : i32, i32
  }
  func.func @transform_1(%arg0: i32) -> (i32, i32) {
    %c0_i32 = arith.constant 0 : i32
    %c0_i32_0 = arith.constant 0 : i32
    %c0_i32_1 = arith.constant 0 : i32
    return %c0_i32, %c0_i32_0 : i32, i32
  }
  func.func @transform_2(%arg0: i32) -> (i32, i32) {
    %c0_i32 = arith.constant 0 : i32
    %c0_i32_0 = arith.constant 0 : i32
    %c0_i32_1 = arith.constant 0 : i32
    return %c0_i32, %c0_i32_0 : i32, i32
  }
  func.func @transform_3(%arg0: i32) -> (i32, i32) {
    %c0_i32 = arith.constant 0 : i32
    %c0_i32_0 = arith.constant 0 : i32
    return %arg0, %c0_i32 : i32, i32
  }
}

</mosaic_0001>

<bundles_post_ra>
// kernel: tpu_custom_call.1
= control target key start
LH: loop header
LB: loop body
LE: loop exit
PB: predicated region body
PF: predicated region fallthrough
CT: control target
= control target key end

     0   :  { %vm28_vm0 = vcmask 261120   ;;  %s240_s0 = inlined_call_operand.vmem [shape: f32[16,32], index: 0, kind: input, shape index: {}]   ;;  %s241_s1 = inlined_call_operand.vmem [shape: f32[32,10], index: 1, kind: input, shape index: {}]   ;;  %s242_s2 = inlined_call_operand.vmem [shape: f32[1,10], index: 2, kind: input, shape index: {}]   ;;  %s243_s3 = inlined_call_operand.hbm [shape: f32[16,10], index: 3, kind: output, shape index: {}]  }
   0x1   :  { %v17_v0 = vld [vmem:[%s241_s1] sm:$0xff]  ;;  %v18_v1 = vld [vmem:[%s241_s1 + $0x8] sm:$0xff]  ;;  %v19_v2 = vld [vmem:[%s241_s1 + $0x10] sm:$0xff] }
   0x2   :  { %v149_v3 = vpack.c.bf16 %v18_v1, %v17_v0  ;;  %v20_v4 = vld [vmem:[%s241_s1 + $0x18] sm:$0xff]  ;;  %v15_v5 = vld [vmem:[%s240_s0] sm:$0xff] }
   0x3   :  { %v153_v6 = vpack.c.bf16 %v20_v4, %v19_v2  ;;  %146 = vmatprep.mubr.msk.f32.mxu0 %vm28_vm0, %v15_v5 }
   0x4   :  { %8 = vsyncpa [#allocation3], 0  ;;  %150 = vmatprep.subr.bf16.mxu0 %v149_v3  ;;  %v16_v7 = vld [vmem:[%s240_s0 + $0x8] sm:$0xff]  ;;  %v129_v8 = vld [vmem:[%s242_s2] ss:$0 sm:$0xff]  ;;  %s184_s1 = smov [#allocation2]  }
   0x5   :  { %152 = vmatpush3.bf16.msra.mxu0 %v149_v3  ;;  %s118_s26 = sshll.u32 %s184_s1, 4  ;;  %vm110_vm1 = vcmask 80896   ;;  %s119_s26 = int_to_ptr.vmem [resolvable:$true] %s118_s26 }
   0x6   :  { %154 = vmatprep.subr.bf16.mxu0 %v153_v6  ;;  %s160_s27 = scalar_lea.vmem %s119_s26, 256  ;;  %p165_p1 = scmp.lt.s32.totalorder %s119_s26, %s119_s26 }
   0x7   :  { %p161_p0 = scmp.ne.s32.totalorder %s119_s26, %s160_s27  ;;  %p166_p2 = scmp.lt.s32.totalorder %s160_s27, %s160_s27 }
   0x9   :  { %156 = vmatpush3.bf16.msra.mxu0 %v153_v6  ;;  %p167_p3 = por %p166_p2, %p165_p1 }
   0xb   :  { %p168_p4 = pnand %p167_p3, %p161_p0 }
   0xc   :  { %147 = vmatmul.mubr.msk.f32.vlgmr.msra.gmra.mrb[0].mxu0 %vm28_vm0, %v16_v7 }
  0xdf   :  { %v148_v9 = vpop.f32.mrb[0].mxu0 }
  0xe0   :  { %v107_v10 = vadd.f32 %v148_v9, %v129_v8  ;;  %v101_v11 = vpop.f32.mrb[1].mxu0 }
  0xe1   :  { %v102_v12 = vadd.f32 %v129_v8, %v101_v11 }
  0xe2   :  { %112 = vst.msk [vmem:[#allocation2 + $0x8] sm:$0xff] %vm110_vm1, %v107_v10 }
  0xe3   :  { %111 = vst.msk [vmem:[#allocation2] sm:$0xff] %vm110_vm1, %v102_v12 }
  0xe4   :  { %171 = shalt.err (!%p168_p4)
}
  0xe5   :  { %s172_s2 = scalar_lea.hbm %s243_s3, 256 }
  0xe6   :  { %p173_p5 = scmp.ne.s32.totalorder %s243_s3, %s172_s2  ;;  %p176_p6 = scmp.lt.u32.totalorder %s172_s2, %s243_s3 }
  0xe8   :  { %p178_p7 = pnand %p176_p6, %p173_p5 }
  0xea   :  { %181 = shalt.err (!%p178_p7)
}
  0xeb   :  { %s185_s6 = smov 128   ;;  %s186_s7 = smov 8  }
  0xec   :  { %124 = dma.vmem_to_hbm [thread:$0]  %s119_s26, 256, %s243_s3, [#allocation3], %s185_s6, %s185_s6, %s186_s7  }
  0xed   :  { %182 = dma.done.wait [#allocation3], 256  }
  0xee   :  { %183 = vsyncadd [#allocation3], 4294967040 }
  0xef   :  { %128 = vsyncpa [#allocation3], 1 }

</bundles_post_ra>
